<compile_context>
chip_gen: v6e
topology: v6e:2x2x1
jax: 0.10.0
libtpu: 0.0.40
codegen_flags: <defaults>
</compile_context>

<pallas_src>
import jax
import jax.numpy as jnp
from jax.experimental import pallas as pl
from jax.experimental.pallas import tpu as pltpu


def _round_up(n, m):
    return (n + m - 1) // m * m


def classblock_kernel(x_ref, w_ref, b_ref, o_ref):
    # LeakyReLU(0.1) on the VPU, in f32.
    x = x_ref[...]
    x = jnp.where(x >= 0, x, 0.1 * x)
    # Dropout(p=0.5): identity at inference time.
    # Linear on the MXU: bf16 operands, f32 accumulation.
    acc = jnp.dot(
        x.astype(jnp.bfloat16), w_ref[...], preferred_element_type=jnp.float32
    )
    # Bias add in f32, exactly once per (M, N) output tile.
    o_ref[...] = (acc + b_ref[...]).astype(o_ref.dtype)


def class_block(x, weight, bias, *, tile_m=512, tile_n=256):
    """Fused LeakyReLU(0.1) -> Dropout(eval identity) -> Linear.

    x: (B, D) f32, weight: (C, D) f32 (PyTorch nn.Linear layout), bias: (C,) f32.
    Returns (B, C) f32 == leaky_relu(x) @ weight.T + bias.
    """
    B, D = x.shape
    C, D2 = weight.shape
    assert D == D2 and bias.shape == (C,)

    # Lane/sublane-friendly padded sizes.
    tile_n = min(tile_n, _round_up(C, 128))   # multiple of 128: lane-dense output
    tile_m = min(tile_m, _round_up(B, 8))     # multiple of 8: full sublanes
    Bp = _round_up(B, tile_m)
    Cp = _round_up(C, tile_n)
    Dp = _round_up(D, 128)

    # Zero-padding is inert: leaky_relu(0) = 0 and zero rows/cols of W/b add 0.
    x_p = jnp.pad(x, ((0, Bp - B), (0, Dp - D)))
    w_p = jnp.pad(weight.T, ((0, Dp - D), (0, Cp - C))).astype(jnp.bfloat16)
    b_p = jnp.pad(bias, (0, Cp - C)).reshape(1, Cp)

    grid = (Bp // tile_m, Cp // tile_n)
    vmem = pltpu.MemorySpace.VMEM

    out_p = pl.pallas_call(
        classblock_kernel,
        out_shape=jax.ShapeDtypeStruct((Bp, Cp), jnp.float32),
        grid=grid,
        in_specs=[
            # x tile: index independent of N axis -> resident across j sweep.
            pl.BlockSpec((tile_m, Dp), lambda i, j: (i, 0), memory_space=vmem),
            # W tile: index independent of M axis -> resident across i sweep.
            pl.BlockSpec((Dp, tile_n), lambda i, j: (0, j), memory_space=vmem),
            # Bias tile, broadcast along M.
            pl.BlockSpec((1, tile_n), lambda i, j: (0, j), memory_space=vmem),
        ],
        out_specs=pl.BlockSpec(
            (tile_m, tile_n), lambda i, j: (i, j), memory_space=vmem
        ),
        compiler_params=pltpu.CompilerParams(
            dimension_semantics=("parallel", "parallel")
        ),
    )(x_p, w_p, b_p)

    return out_p[:B, :C]


if __name__ == "__main__":
    key = jax.random.PRNGKey(0)
    k_x, k_w = jax.random.split(key, 2)

    # Shapes implied by the module: x: (batch, input_dim) -> (batch, class_num)
    batch, input_dim, class_num = 8, 32, 16

    x = jax.random.normal(k_x, (batch, input_dim), dtype=jnp.float32)

    # weights_init_classifier: Linear.weight ~ N(0, 0.001), bias = 0.
    weight = 0.001 * jax.random.normal(
        k_w, (class_num, input_dim), dtype=jnp.float32
    )
    bias = jnp.zeros((class_num,), dtype=jnp.float32)

    out = jax.block_until_ready(class_block(x, weight, bias))

    # Pure-JAX reference (eval mode: dropout is identity). The matmul uses bf16
    # operands with f32 accumulation to mirror the kernel's MXU precision.
    x_act = jnp.where(x >= 0, x, 0.1 * x)
    ref = (
        jnp.dot(
            x_act.astype(jnp.bfloat16),
            weight.T.astype(jnp.bfloat16),
            preferred_element_type=jnp.float32,
        )
        + bias
    )
    assert out.shape == (batch, class_num)
    assert jnp.allclose(out, ref, atol=2e-3, rtol=2e-2), float(
        jnp.max(jnp.abs(out - ref))
    )

    print("KERNEL_OK")
</pallas_src>

<mosaic_0001>
module attributes {stable_mosaic.version = 11 : i64} {
  func.func @classblock_kernel(%arg0: i32, %arg1: i32, %arg2: memref<8x128xf32, #tpu.memory_space<vmem>>, %arg3: memref<128x128xbf16, #tpu.memory_space<vmem>>, %arg4: memref<1x128xf32, #tpu.memory_space<vmem>>, %arg5: memref<8x128xf32, #tpu.memory_space<vmem>>) attributes {dimension_semantics = [#tpu.dimension_semantics<parallel>, #tpu.dimension_semantics<parallel>], iteration_bounds = array<i64: 1, 1>, scalar_prefetch = 0 : i64, scratch_operands = 0 : i64, tpu.core_type = #tpu.core_type<tc>, window_params = [{transform_indices = @transform_0, window_bounds = array<i64: 8, 128>}, {transform_indices = @transform_1, window_bounds = array<i64: 128, 128>}, {transform_indices = @transform_2, window_bounds = array<i64: 1, 128>}, {transform_indices = @transform_3, window_bounds = array<i64: 8, 128>}]} {
    %c0 = arith.constant 0 : index
    %c0_0 = arith.constant 0 : index
    %0 = vector.load %arg2[%c0, %c0_0] : memref<8x128xf32, #tpu.memory_space<vmem>>, vector<8x128xf32>
    %cst = arith.constant 0.000000e+00 : f32
    %1 = vector.broadcast %cst : f32 to vector<8x128xf32>
    %2 = arith.cmpf oge, %0, %1 : vector<8x128xf32>
    %cst_1 = arith.constant 1.000000e-01 : f32
    %3 = vector.broadcast %cst_1 : f32 to vector<8x128xf32>
    %4 = arith.mulf %3, %0 : vector<8x128xf32>
    %5 = arith.select %2, %0, %4 : vector<8x128xi1>, vector<8x128xf32>
    %6 = arith.truncf %5 : vector<8x128xf32> to vector<8x128xbf16>
    %c0_2 = arith.constant 0 : index
    %c0_3 = arith.constant 0 : index
    %7 = vector.load %arg3[%c0_2, %c0_3] : memref<128x128xbf16, #tpu.memory_space<vmem>>, vector<128x128xbf16>
    %cst_4 = arith.constant dense<0.000000e+00> : vector<8x128xf32>
    %8 = tpu.matmul %6, %7, %cst_4 {dimension_numbers = #tpu.dot_dimension_numbers<[1], [0], [0], [1], [0, 0, 1, 1], [], []>} : vector<8x128xbf16>, vector<128x128xbf16>, vector<8x128xf32> -> vector<8x128xf32>
    %c0_5 = arith.constant 0 : index
    %c0_6 = arith.constant 0 : index
    %9 = vector.load %arg4[%c0_5, %c0_6] : memref<1x128xf32, #tpu.memory_space<vmem>>, vector<1x128xf32>
    %10 = vector.broadcast %9 : vector<1x128xf32> to vector<8x128xf32>
    %11 = arith.addf %8, %10 : vector<8x128xf32>
    %c0_7 = arith.constant 0 : index
    %c0_8 = arith.constant 0 : index
    %12 = vector.load %arg5[%c0_7, %c0_8] : memref<8x128xf32, #tpu.memory_space<vmem>>, vector<8x128xf32>
    tpu.vector_store %arg5[%c0_7, %c0_8], %11 {strides = array<i32>} : memref<8x128xf32, #tpu.memory_space<vmem>>, vector<8x128xf32>,
    return
  }
  func.func @transform_0(%arg0: i32, %arg1: i32) -> (i32, i32) {
    %c0_i32 = arith.constant 0 : i32
    %c0_i32_0 = arith.constant 0 : i32
    return %arg0, %c0_i32 : i32, i32
  }
  func.func @transform_1(%arg0: i32, %arg1: i32) -> (i32, i32) {
    %c0_i32 = arith.constant 0 : i32
    %c0_i32_0 = arith.constant 0 : i32
    return %c0_i32, %arg1 : i32, i32
  }
  func.func @transform_2(%arg0: i32, %arg1: i32) -> (i32, i32) {
    %c0_i32 = arith.constant 0 : i32
    %c0_i32_0 = arith.constant 0 : i32
    return %c0_i32, %arg1 : i32, i32
  }
  func.func @transform_3(%arg0: i32, %arg1: i32) -> (i32, i32) {
    %c0_i32 = arith.constant 0 : i32
    return %arg0, %arg1 : i32, i32
  }
}

</mosaic_0001>

<bundles_post_ra>
// kernel: tpu_custom_call.1
= control target key start
LH: loop header
LB: loop body
LE: loop exit
PB: predicated region body
PF: predicated region fallthrough
CT: control target
= control target key end

     0   :  { %8 = vsyncpa [#allocation3], 0  ;;  %s333_s0 = inlined_call_operand.hbm [shape: f32[8,128], index: 0, kind: input, shape index: {}]   ;;  %s334_s1 = inlined_call_operand.hbm [shape: bf16[128,128], index: 1, kind: input, shape index: {}]   ;;  %s335_s2 = inlined_call_operand.vmem [shape: f32[1,128], index: 2, kind: input, shape index: {}]   ;;  %s336_s3 = inlined_call_operand.hbm [shape: f32[8,128], index: 3, kind: output, shape index: {}]  }
   0x1   :  { %9 = vsyncpa [#allocation6], 0 }
   0x2   :  { %10 = vsyncpa [#allocation4], 0  ;;  %s294_s12 = smov [#allocation2]   ;;  %s295_s14 = smov [#allocation5]  }
   0x3   :  { %s17_s13 = sshll.u32 %s294_s12, 4  ;;  %s26_s15 = sshll.u32 %s295_s14, 4  ;;  %s18_s13 = int_to_ptr.vmem [resolvable:$true] %s17_s13  ;;  %s27_s15 = int_to_ptr.vmem [resolvable:$true] %s26_s15 }
   0x4   :  { %s236_s16 = scalar_lea.vmem %s18_s13, 128  ;;  %p241_p1 = scmp.lt.s32.totalorder %s18_s13, %s18_s13 }
   0x5   :  { %p237_p0 = scmp.ne.s32.totalorder %s18_s13, %s236_s16  ;;  %p242_p2 = scmp.lt.s32.totalorder %s236_s16, %s236_s16 }
   0x7   :  { %p243_p3 = por %p242_p2, %p241_p1 }
   0x9   :  { %p244_p4 = pnand %p243_p3, %p237_p0 }
   0xb   :  { %247 = shalt.err (!%p244_p4)
}
   0xc   :  { %20 = dma.hbm_to_vmem [thread:$0]  %s333_s0, 128, %s18_s13, [#allocation3]  }
   0xd   :  { %s256_s19 = scalar_lea.vmem %s27_s15, 1024  ;;  %p261_p6 = scmp.lt.s32.totalorder %s27_s15, %s27_s15 }
   0xe   :  { %p257_p5 = scmp.ne.s32.totalorder %s27_s15, %s256_s19  ;;  %p262_p7 = scmp.lt.s32.totalorder %s256_s19, %s256_s19 }
  0x10   :  { %p263_p8 = por %p262_p7, %p261_p6 }
  0x12   :  { %p264_p9 = pnand %p263_p8, %p257_p5 }
  0x14   :  { %267 = shalt.err (!%p264_p9)
}
  0x15   :  { %s296_s20 = smov 64   ;;  %s297_s21 = smov 4  }
  0x16   :  { %32 = dma.hbm_to_vmem [thread:$0]  %s334_s1, 1024, %s27_s15, [#allocation6], %s296_s20, %s296_s20, %s297_s21  }
  0x17   :  { %288 = dma.done.wait [#allocation3], 128  }
  0x18   :  { %289 = vsyncadd [#allocation3], 4294967168 }
  0x19   :  { %290 = dma.done.wait [#allocation6], 1024  }
  0x1a   :  { %291 = vsyncadd [#allocation6], 4294966272  ;;  %v298_v0 = vmov 0.0   ;;  %vm299_vm0 = vmmov 0   ;;  %v220_v1 = vld [vmem:[#allocation5 + $0x38] sm:$0xff]   ;;  %v221_v2 = vld [vmem:[#allocation5 + $0x30] sm:$0xff]  }
  0x1b   :  { %193 = vmatprep.subr.bf16.mxu0 %v298_v0  ;;  %209 = vmatprep.mubr.msk.bf16.mxu0 %vm299_vm0, %v298_v0  ;;  %v222_v3 = vld [vmem:[#allocation5 + $0x28] sm:$0xff]   ;;  %v223_v4 = vld [vmem:[#allocation5 + $0x20] sm:$0xff]   ;;  %v224_v5 = vld [vmem:[#allocation5 + $0x18] sm:$0xff]   ;;  %s300_s24 = smov [#allocation7]  }
  0x1c   :  { %194 = vmatpush3.bf16.msra.mxu0 %v220_v1  ;;  %v225_v6 = vld [vmem:[#allocation5 + $0x10] sm:$0xff]   ;;  %v42_v7 = vld [vmem:[#allocation2] sm:$0xff]  ;;  %v226_v8 = vld [vmem:[#allocation5 + $0x8] sm:$0xff]   ;;  %s165_s25 = sshll.u32 %s300_s24, 4  ;;  %s166_s25 = int_to_ptr.vmem [resolvable:$true] %s165_s25 }
  0x1d   :  { %195 = vmatprep.subr.bf16.mxu0 %v298_v0  ;;  %v44_v9 = vmul.f32 0.1, %v42_v7  ;;  %vm43_vm1 = vcmp.ge.f32.partialorder %v42_v7, 0.0  ;;  %v227_v10 = vld [vmem:[#allocation5] sm:$0xff]   ;;  %v175_v13 = vld [vmem:[%s335_s2] ss:$0 sm:$0xff]  ;;  %p273_p11 = scmp.lt.s32.totalorder %s166_s25, %s166_s25 }
  0x1e   :  { %s268_s26 = scalar_lea.vmem %s166_s25, 128 }
  0x1f   :  { %v45_v11 = vsel %vm43_vm1, %v42_v7, %v44_v9  ;;  %p269_p10 = scmp.ne.s32.totalorder %s166_s25, %s268_s26  ;;  %p274_p12 = scmp.lt.s32.totalorder %s268_s26, %s268_s26 }
  0x20   :  { %196 = vmatpush3.bf16.msra.mxu0 %v221_v2  ;;  %v46_v12 = vpack.c.bf16 %v45_v11, %v45_v11 }
  0x21   :  { %197 = vmatprep.subr.bf16.mxu0 %v298_v0  ;;  %p275_p13 = por %p274_p12, %p273_p11 }
  0x23   :  { %p276_p0 = pnand %p275_p13, %p269_p10 }
  0x24   :  { %198 = vmatpush3.bf16.msra.mxu0 %v222_v3 }
  0x25   :  { %199 = vmatprep.subr.bf16.mxu0 %v298_v0 }
  0x28   :  { %200 = vmatpush3.bf16.msra.mxu0 %v223_v4 }
  0x29   :  { %201 = vmatprep.subr.bf16.mxu0 %v298_v0 }
  0x2c   :  { %202 = vmatpush3.bf16.msra.mxu0 %v224_v5 }
  0x2d   :  { %203 = vmatprep.subr.bf16.mxu0 %v298_v0 }
  0x30   :  { %204 = vmatpush3.bf16.msra.mxu0 %v225_v6 }
  0x31   :  { %205 = vmatprep.subr.bf16.mxu0 %v298_v0 }
  0x34   :  { %206 = vmatpush3.bf16.msra.mxu0 %v226_v8 }
  0x35   :  { %207 = vmatprep.subr.bf16.mxu0 %v298_v0 }
  0x38   :  { %208 = vmatpush3.bf16.msra.mxu0 %v227_v10 }
  0x3b   :  { %210 = vmatmul.mubr.bf16.vlgmr.msra.gmra.mxu0 %v46_v12 }
  0xfb   :  { %v152_v14 = vpop.f32.mrf.mxu0 }
  0xfc   :  { %v153_v15 = vadd.f32 %v175_v13, %v152_v14 }
  0xfd   :  { %v211_v16 = vpop.f32.mrf.mxu0 }
  0xfe   :  { %158 = vst [vmem:[#allocation7] sm:$0xff] %v153_v15 }
  0xff   :  { %v155_v17 = vpop.f32.mrf.mxu0 }
 0x100   :  { %279 = shalt.err (!%p276_p0)
}
 0x101   :  { %168 = dma.vmem_to_hbm [thread:$0]  %s166_s25, 128, %s336_s3, [#allocation4]   ;;  %v212_v18 = vpop.f32.mrf.mxu0 }
 0x102   :  { %292 = dma.done.wait [#allocation4], 128  }
 0x103   :  { %293 = vsyncadd [#allocation4], 4294967168 }
 0x104   :  { %172 = vsyncpa [#allocation3], 1 }
 0x105   :  { %173 = vsyncpa [#allocation6], 1 }
 0x106   :  { %174 = vsyncpa [#allocation4], 1 }

</bundles_post_ra>
